<compile_context>
chip_gen: v6e
topology: v6e:2x2x1
jax: 0.10.0
libtpu: 0.0.40
codegen_flags: <defaults>
</compile_context>

<pallas_src>
import functools

import jax
import jax.numpy as jnp
from jax.experimental import pallas as pl
from jax.experimental.pallas import tpu as pltpu


def _pool_kernel(x_ref, o_ref, acc_ref, *, mode: str, inv_len: float, init_val,
                 seq_len: int, mask_seq_tail: bool):
    """One grid step: fold a (TB, TS, H) tile into the (TB, H) accumulator."""
    ks = pl.program_id(1)

    @pl.when(ks == 0)
    def _init():
        acc_ref[...] = jnp.full(acc_ref.shape, init_val, acc_ref.dtype)

    x = x_ref[...]  # (TB, TS, H) in the native dtype -- no full-tile upcast copy.
    if mask_seq_tail:  # trace-time flag: only emitted when TS does not divide seq_len
        ts = x.shape[1]
        remaining = seq_len - ks * ts  # >= ts on every step but the last
        seq_idx = jax.lax.broadcasted_iota(jnp.int32, x.shape, 1)
        fill = init_val if mode == "max" else 0
        x = jnp.where(seq_idx < remaining, x, jnp.asarray(fill, x.dtype))

    if mode == "max":
        # max is exact in the native dtype; accumulator dtype == input dtype.
        acc_ref[...] = jnp.maximum(acc_ref[...], jnp.max(x, axis=1))
    else:  # sum / mean accumulate a running sum; upcast fuses into the reduction.
        acc_ref[...] += jnp.sum(x, axis=1, dtype=acc_ref.dtype)

    @pl.when(ks == pl.num_programs(1) - 1)
    def _finalize():
        acc = acc_ref[...]
        if mode == "mean":
            acc = acc * inv_len
        o_ref[...] = acc.astype(o_ref.dtype)


def _round_up(x: int, m: int) -> int:
    return -(-x // m) * m


def _tile_bytes(lead: int, rows: int, cols: int, dtype) -> int:
    """VMEM footprint of a (lead, rows, cols) tile incl. (sublane, 128-lane) padding."""
    it = jnp.dtype(dtype).itemsize
    sub = max(8, 32 // it)  # 8 for 4B, 16 for 2B, 32 for 1B dtypes
    return lead * _round_up(rows, sub) * _round_up(cols, 128) * it


def _choose_tiles(b: int, s: int, h: int, dtype, target_bytes: int,
                  max_seq_tile=None):
    """Pick (TB, TS) for ~target_bytes input blocks, preferring a larger seq tile."""
    itemsize = jnp.dtype(dtype).itemsize
    sub = max(8, 32 // itemsize)                  # sublane multiple for this dtype
    row_bytes = _round_up(h, 128) * itemsize      # one padded sequence row in VMEM

    # Batch tile: keep >= 2 batch-grid steps whenever b can be split into
    # multiple-of-8 blocks, so the "parallel" axis shards across v7x's 2 TensorCores.
    if b > 8:
        tb = 8
        tb_cap = min(_round_up((b + 1) // 2, 8), b - 1)
    else:
        tb = b
        tb_cap = b

    # Sequence tile: largest sublane multiple that fits the target (grow ts first).
    ts = max(sub, (target_bytes // max(1, tb * row_bytes)) // sub * sub)
    if max_seq_tile is not None:
        ts = min(ts, max(sub, (max_seq_tile // sub) * sub))
    if ts >= s:
        ts = s  # whole sequence per step (ts == s is always a legal block dim)
        # Block still below target -> grow the batch tile in multiples of 8, capped so
        # the batch grid keeps >= 2 steps (megacore) whenever possible.
        blk8 = 8 * _round_up(ts, sub) * row_bytes
        tb = int(min(tb_cap, max(tb, (target_bytes // max(1, blk8)) * 8)))
        tb = max(tb, 1)
    return tb, ts


def sequence_pooling(x: jax.Array, mode: str = "max", *,
                     target_block_bytes: int = 8 << 20,
                     max_seq_tile=None) -> jax.Array:
    """Pallas implementation of SequencePooling.forward.

    Args:
        x: [batch_size, seq_len, hid_dim]
    Returns:
        [batch_size, hid_dim]
    """
    mode = mode.lower()
    assert mode in ["max", "mean", "sum"], f"Mode {mode} is not supported!"
    b, s, h = x.shape

    is_float = jnp.issubdtype(x.dtype, jnp.floating)
    if mode == "mean" and not is_float:
        # Matches torch semantics: mean is only defined for floating dtypes.
        raise ValueError("mean pooling requires a floating-point input dtype")

    if mode == "max":
        acc_dtype = x.dtype          # max is exact in the native dtype
        out_dtype = x.dtype
        init_val = -jnp.inf if is_float else int(jnp.iinfo(x.dtype).min)
    else:
        acc_dtype = jnp.float32 if is_float else jnp.int32
        # TODO(synk): torch promotes integer sums to int64; int32 is the closest TPU-native dtype.
        out_dtype = x.dtype if is_float else jnp.int32
        init_val = 0

    tb, ts = _choose_tiles(b, s, h, x.dtype, target_block_bytes, max_seq_tile)
    grid = (pl.cdiv(b, tb), pl.cdiv(s, ts))
    mask_seq_tail = (s % ts) != 0

    # Layout-aware VMEM accounting (lanes padded to 128, sublanes to the dtype multiple).
    in_blk = _tile_bytes(tb, ts, h, x.dtype)
    out_blk = _tile_bytes(1, tb, h, out_dtype)
    acc_blk = _tile_bytes(1, tb, h, acc_dtype)

    use_triple = in_blk <= (4 << 20) and (grid[0] * grid[1]) >= 3
    n_in_bufs = 3 if use_triple else 2
    vmem_needed = n_in_bufs * in_blk + 2 * out_blk + acc_blk + (4 << 20)
    try:  # 75% of physical VMEM: v5e/v6e -> 96 MiB, v7x -> 48 MiB.
        vmem_cap = int(pltpu.get_tpu_info().vmem_capacity_bytes) * 3 // 4
    except Exception:
        vmem_cap = 48 << 20  # conservative: safe on every generation
    vmem_limit = int(min(max(vmem_needed, 16 << 20), vmem_cap))
    # TODO(synk): for hid_dim so large that even a (tb, sublane, hid) block exceeds the VMEM
    # cap, a third "parallel" grid axis over hid_dim would be needed; not implemented here.

    kernel = functools.partial(
        _pool_kernel, mode=mode, inv_len=1.0 / s, init_val=init_val,
        seq_len=s, mask_seq_tail=mask_seq_tail,
    )

    in_spec_kwargs = {"pipeline_mode": pl.Buffered(3)} if use_triple else {}
    cost = pl.CostEstimate(
        flops=b * s * h,
        transcendentals=0,
        bytes_accessed=b * s * h * jnp.dtype(x.dtype).itemsize
        + b * h * jnp.dtype(out_dtype).itemsize,
    )

    return pl.pallas_call(
        kernel,
        out_shape=jax.ShapeDtypeStruct((b, h), out_dtype),
        grid=grid,
        in_specs=[pl.BlockSpec((tb, ts, h), lambda i, k: (i, k, 0), **in_spec_kwargs)],
        out_specs=pl.BlockSpec((tb, h), lambda i, k: (i, 0)),
        scratch_shapes=[pltpu.VMEM((tb, h), acc_dtype)],
        compiler_params=pltpu.CompilerParams(
            dimension_semantics=("parallel", "arbitrary"),
            vmem_limit_bytes=vmem_limit,
        ),
        cost_estimate=cost,
    )(x)


if __name__ == "__main__":
    key = jax.random.PRNGKey(0)
    k1, k2, k3 = jax.random.split(key, 3)
    ok = True

    def check(x, mode, ref, atol, **kw):
        out = jax.block_until_ready(sequence_pooling(x, mode=mode, **kw))
        return out.shape == ref.shape and bool(
            jnp.allclose(out, ref, atol=atol, rtol=1e-4))

    # Small shape consistent with the module docstring: [batch, seq_len, hid_dim].
    x = jax.random.normal(k1, (2, 8, 32), dtype=jnp.float32)
    ok &= check(x, "max", jnp.max(x, axis=1), 1e-5)
    ok &= check(x, "mean", jnp.mean(x, axis=1), 1e-5)
    ok &= check(x, "sum", jnp.sum(x, axis=1), 1e-5)

    # Multi-step seq grid with a masked partial tail (seq tile capped just for the test).
    x = jax.random.normal(k2, (2, 20, 32), dtype=jnp.float32)
    ok &= check(x, "max", jnp.max(x, axis=1), 1e-5, max_seq_tile=8)
    ok &= check(x, "mean", jnp.mean(x, axis=1), 1e-5, max_seq_tile=8)
    ok &= check(x, "sum", jnp.sum(x, axis=1), 1e-5, max_seq_tile=8)

    # Batch split across >= 2 "parallel" grid steps (megacore) + accumulator init/finalize.
    x = jax.random.normal(k3, (16, 2048, 256), dtype=jnp.float32)
    ok &= check(x, "max", jnp.max(x, axis=1), 1e-4)
    ok &= check(x, "mean", jnp.mean(x, axis=1), 1e-4)
    ok &= check(x, "sum", jnp.sum(x, axis=1), 1e-2)

    print("KERNEL_OK" if ok else "KERNEL_MISMATCH")
</pallas_src>

<mosaic_0001>
module attributes {stable_mosaic.version = 11 : i64} {
  func.func @_pool_kernel(%arg0: i32, %arg1: i32, %arg2: memref<2x8x32xf32, #tpu.memory_space<vmem>>, %arg3: memref<2x32xf32, #tpu.memory_space<vmem>>, %arg4: memref<2x32xf32, #tpu.memory_space<vmem>>) attributes {dimension_semantics = [#tpu.dimension_semantics<parallel>, #tpu.dimension_semantics<arbitrary>], iteration_bounds = array<i64: 1, 1>, scalar_prefetch = 0 : i64, scratch_operands = 1 : i64, tpu.core_type = #tpu.core_type<tc>, window_params = [{transform_indices = @transform_0, window_bounds = array<i64: 2, 8, 32>}, {transform_indices = @transform_1, window_bounds = array<i64: 2, 32>}]} {
    %c0_i32 = arith.constant 0 : i32
    %0 = arith.cmpi eq, %arg1, %c0_i32 : i32
    %1 = arith.extui %0 : i1 to i32
    %c0_i32_0 = arith.constant 0 : i32
    %2 = arith.cmpi ne, %1, %c0_i32_0 : i32
    scf.if %2 {
      %cst_9 = arith.constant 0xFF800000 : f32
      %11 = vector.broadcast %cst_9 : f32 to vector<2x32xf32>
      %c0_10 = arith.constant 0 : index
      %c0_11 = arith.constant 0 : index
      %12 = vector.load %arg4[%c0_10, %c0_11] : memref<2x32xf32, #tpu.memory_space<vmem>>, vector<2x32xf32>
      tpu.vector_store %arg4[%c0_10, %c0_11], %11 {strides = array<i32>} : memref<2x32xf32, #tpu.memory_space<vmem>>, vector<2x32xf32>,
    } else {
    }
    %c0 = arith.constant 0 : index
    %c0_1 = arith.constant 0 : index
    %c0_2 = arith.constant 0 : index
    %3 = vector.load %arg2[%c0, %c0_1, %c0_2] : memref<2x8x32xf32, #tpu.memory_space<vmem>>, vector<2x8x32xf32>
    %c0_3 = arith.constant 0 : index
    %c0_4 = arith.constant 0 : index
    %4 = vector.load %arg4[%c0_3, %c0_4] : memref<2x32xf32, #tpu.memory_space<vmem>>, vector<2x32xf32>
    %cst = arith.constant dense<0xFF800000> : vector<2x32xf32>
    %5 = vector.multi_reduction <maximumf>, %3, %cst [1] : vector<2x8x32xf32> to vector<2x32xf32>
    %6 = arith.maximumf %4, %5 : vector<2x32xf32>
    %c0_5 = arith.constant 0 : index
    %c0_6 = arith.constant 0 : index
    %7 = vector.load %arg4[%c0_5, %c0_6] : memref<2x32xf32, #tpu.memory_space<vmem>>, vector<2x32xf32>
    tpu.vector_store %arg4[%c0_5, %c0_6], %6 {strides = array<i32>} : memref<2x32xf32, #tpu.memory_space<vmem>>, vector<2x32xf32>,
    %c0_i32_7 = arith.constant 0 : i32
    %8 = arith.cmpi eq, %arg1, %c0_i32_7 : i32
    %9 = arith.extui %8 : i1 to i32
    %c0_i32_8 = arith.constant 0 : i32
    %10 = arith.cmpi ne, %9, %c0_i32_8 : i32
    scf.if %10 {
      %c0_9 = arith.constant 0 : index
      %c0_10 = arith.constant 0 : index
      %11 = vector.load %arg4[%c0_9, %c0_10] : memref<2x32xf32, #tpu.memory_space<vmem>>, vector<2x32xf32>
      %c0_11 = arith.constant 0 : index
      %c0_12 = arith.constant 0 : index
      %12 = vector.load %arg3[%c0_11, %c0_12] : memref<2x32xf32, #tpu.memory_space<vmem>>, vector<2x32xf32>
      tpu.vector_store %arg3[%c0_11, %c0_12], %11 {strides = array<i32>} : memref<2x32xf32, #tpu.memory_space<vmem>>, vector<2x32xf32>,
    } else {
    }
    return
  }
  func.func @transform_0(%arg0: i32, %arg1: i32) -> (i32, i32, i32) {
    %c0_i32 = arith.constant 0 : i32
    %c0_i32_0 = arith.constant 0 : i32
    return %arg0, %arg1, %c0_i32 : i32, i32, i32
  }
  func.func @transform_1(%arg0: i32, %arg1: i32) -> (i32, i32) {
    %c0_i32 = arith.constant 0 : i32
    %c0_i32_0 = arith.constant 0 : i32
    return %arg0, %c0_i32 : i32, i32
  }
}

</mosaic_0001>

<bundles_post_ra>
// kernel: tpu_custom_call.1
= control target key start
LH: loop header
LB: loop body
LE: loop exit
PB: predicated region body
PF: predicated region fallthrough
CT: control target
= control target key end

     0   :  { %6 = vsyncpa [#allocation4], 0  ;;  %s148_s0 = inlined_call_operand.hbm [shape: f32[2,8,32], index: 0, kind: input, shape index: {}]   ;;  %s149_s1 = inlined_call_operand.hbm [shape: f32[2,32], index: 1, kind: output, shape index: {}]  }
   0x1   :  { %7 = vsyncpa [#allocation5], 0  ;;  %s124_s6 = smov [#allocation3]  }
   0x2   :  { %s13_s7 = sshll.u32 %s124_s6, 4  ;;  %s14_s7 = int_to_ptr.vmem [resolvable:$true] %s13_s7 }
   0x3   :  { %s88_s8 = scalar_lea.vmem %s14_s7, 256  ;;  %p93_p1 = scmp.lt.s32.totalorder %s14_s7, %s14_s7 }
   0x4   :  { %p89_p0 = scmp.ne.s32.totalorder %s14_s7, %s88_s8  ;;  %p94_p2 = scmp.lt.s32.totalorder %s88_s8, %s88_s8 }
   0x6   :  { %p95_p3 = por %p94_p2, %p93_p1 }
   0x8   :  { %p96_p4 = pnand %p95_p3, %p89_p0 }
   0xa   :  { %99 = shalt.err (!%p96_p4)
}
   0xb   :  { %s125_s9 = smov 128   ;;  %s126_s10 = smov 8  }
   0xc   :  { %19 = dma.hbm_to_vmem [thread:$0]  %s148_s0, 256, %s14_s7, [#allocation4], %s125_s9, %s125_s9, %s126_s10  }
   0xd   :  { %120 = dma.done.wait [#allocation4], 256  }
   0xe   :  { %121 = vsyncadd [#allocation4], 4294967040  ;;  %vm27_vm0 = vcmask 254976   ;;  %v127_v0 = vmov -inf   ;;  %vm32_vm1 = vcmask 261120   ;;  %v29_v1 = vld [vmem:[#allocation3] sm:$0xff] }
   0xf   :  { %28 = vst.msk [vmem:[#allocation2] sm:$0x3] %vm27_vm0, %v127_v0  ;;  %v30_v2 = vld [vmem:[#allocation3 + $0x8] sm:$0xff]  ;;  %v33_v3 = vsel %vm32_vm1, %v29_v1, -inf  ;;  %vm49_vm2 = vcmask 1041409   ;;  %s128_s0 = smov [#allocation6]  }
  0x10   :  { %v40_v4 = vsel %vm32_vm1, %v30_v2, -inf  ;;  %v34_v5 = vrot.slane %v33_v3, 4  ;;  %s66_s13 = sshll.u32 %s128_s0, 4  ;;  %s67_s13 = int_to_ptr.vmem [resolvable:$true] %s66_s13 }
  0x11   :  { %v41_v6 = vrot.slane %v40_v4, 4  ;;  %s100_s14 = scalar_lea.vmem %s67_s13, 32  ;;  %p105_p6 = scmp.lt.s32.totalorder %s67_s13, %s67_s13 }
  0x12   :  { %v35_v7 = vmax.f32 %v33_v3, %v34_v5  ;;  %p101_p5 = scmp.ne.s32.totalorder %s67_s13, %s100_s14  ;;  %p106_p7 = scmp.lt.s32.totalorder %s100_s14, %s100_s14 }
  0x13   :  { %v42_v8 = vmax.f32 %v40_v4, %v41_v6 }
  0x14   :  { %v36_v9 = vrot.slane %v35_v7, 2  ;;  %p107_p8 = por %p106_p7, %p105_p6 }
  0x15   :  { %v43_v10 = vrot.slane %v42_v8, 2 }
  0x16   :  { %v37_v11 = vmax.f32 %v35_v7, %v36_v9  ;;  %v31_v15 = vld [vmem:[#allocation2] sm:$0x3]  ;;  %p108_p9 = pnand %p107_p8, %p101_p5 }
  0x17   :  { %v44_v12 = vmax.f32 %v42_v8, %v43_v10 }
  0x18   :  { %v38_v13 = vrot.slane %v37_v11, 1 }
  0x19   :  { %v45_v14 = vrot.slane %v44_v12, 1 }
  0x1a   :  { %v39_v16 = vmax.f32 %v37_v11, %v38_v13 }
  0x1b   :  { %v46_v17 = vmax.f32 %v44_v12, %v45_v14 }
  0x1d   :  { %v50_v18 = vsel %vm49_vm2, %v46_v17, %v39_v16 }
  0x1e   :  { %v52_v19 = vmax.f32 %v31_v15, %v50_v18 }
  0x20   :  { %54 = vst.msk [vmem:[#allocation2] sm:$0x3] %vm27_vm0, %v52_v19 }
  0x27   :  { %v58_v20 = vld [vmem:[#allocation2] sm:$0x3] }
  0x28   :  { %59 = vst.msk [vmem:[#allocation6] sm:$0x3] %vm27_vm0, %v58_v20 }
  0x29   :  { %111 = shalt.err (!%p108_p9)
}
  0x2a   :  { %69 = dma.vmem_to_hbm [thread:$0]  %s67_s13, 32, %s149_s1, [#allocation5]  }
  0x2b   :  { %122 = dma.done.wait [#allocation5], 32  }
  0x2c   :  { %123 = vsyncadd [#allocation5], 4294967264 }
  0x2d   :  { %73 = vsyncpa [#allocation4], 1 }
  0x2e   :  { %74 = vsyncpa [#allocation5], 1 }

</bundles_post_ra>
